<compile_context>
chip_gen: v6e
topology: v6e:2x2x1
jax: 0.10.0
libtpu: 0.0.40
codegen_flags: <defaults>
</compile_context>

<pallas_src>
import jax
import jax.numpy as jnp
from jax.experimental import pallas as pl
from jax.experimental.pallas import tpu as pltpu


_ROW_ALIGN = 16  # sublane alignment: bf16 labels tile needs 16; also a multiple of 8 for f32


# ---------------- in-kernel math helpers (pure jnp, VPU/EUP friendly) -------------

def _softplus(x):
    # numerically stable softplus: max(x,0) + log1p(exp(-|x|))
    return jnp.maximum(x, 0.0) + jnp.log1p(jnp.exp(-jnp.abs(x)))


def _logsumexp2(a, b):
    """log(exp(a) + exp(b)); also returns t = exp(-|a-b|) for reuse."""
    t = jnp.exp(-jnp.abs(a - b))
    return jnp.maximum(a, b) + jnp.log1p(t), t


# ---------------------------------- kernel ----------------------------------------

def _lmh_kernel(params_ref,   # SMEM (3,) f32: [bias_lin_b, smooth_param, constant_smooth]
                nrows_ref,    # SMEM (1,) i32: true batch size B
                logits_ref,   # VMEM (TILE_B, N) f32
                labels_ref,   # VMEM (TILE_B, N) bf16
                bias_ref,     # VMEM (TILE_B, N) f32
                hidden_ref,   # VMEM (TILE_B, H) f32
                w_lin_ref,    # VMEM (1, H) f32
                out_ref):     # VMEM (16, N): rows 0-7 = loss partial slab, 8-15 = entropy slab
    b_lin = params_ref[0]
    smooth_param = params_ref[1]
    constant_smooth = params_ref[2]
    nrows = nrows_ref[0]

    logits = logits_ref[...]
    labels = labels_ref[...].astype(jnp.float32)   # bf16 in HBM, f32 math
    bias = bias_ref[...]
    hidden = hidden_ref[...]
    w_row = w_lin_ref[...]                          # (1, H)

    tile_b = logits.shape[0]
    n = logits.shape[1]

    # Row-validity mask. No wrapper padding: the ragged last tile's out-of-range
    # rows hold unspecified data, so they are removed below with where-selects.
    row = jax.lax.broadcasted_iota(jnp.int32, (tile_b, 1), 0) + pl.program_id(0) * tile_b
    valid = row < nrows                             # (TILE_B, 1) bool

    # ---- bias_convert ----
    # Thin Linear(H, 1) projection, kept on the VPU (exact f32, tiny next to the
    # (TILE_B, N) transcendental chain). MXU offload only pays for H >= 512 and
    # risks f32-as-bf16 multipass precision, so it stays here.
    factor = jnp.sum(hidden * w_row, axis=-1, keepdims=True) + b_lin      # (TILE_B, 1)
    factor = _softplus(factor)

    soften = 1.0 / (1.0 + jnp.exp(-smooth_param))   # sigmoid(smooth_param)
    c = constant_smooth + soften                    # hoisted scalar
    bc0 = jnp.log(bias + c) * factor                # channel 0:  bias
    bc1 = jnp.log((1.0 + c) - bias) * factor        # channel 1:  1 - bias

    # ---- loss_compute ----
    log_prob = -_softplus(-logits)                  # log(sigmoid(logits))
    log_one_minus_prob = -logits + log_prob         # log(1 - sigmoid(logits))
    l0 = bc0 + log_prob
    l1 = bc1 + log_one_minus_prob
    norm, _ = _logsumexp2(l0, l1)
    lp = l0 - norm
    lomp = l1 - norm
    loss_elem = -(lomp + labels * (lp - lomp))      # == -(labels*lp + (1-labels)*lomp)
    # TODO(synk): optional 'miu'/'mask' smoothing branch not exercised (kwargs absent).

    # ---- entropy penalty (LearnedMixinH) ----
    bnorm, t = _logsumexp2(bc0, bc1)
    blp0 = bc0 - bnorm
    blp1 = bc1 - bnorm
    d = 1.0 + t
    inv = pl.reciprocal(d, approx=True)
    inv = inv * (2.0 - d * inv)                     # one Newton step (keeps 1e-4 tolerance)
    p0 = jnp.where(bc0 >= bc1, inv, t * inv)        # exp(blp0) without an extra exp
    ent_elem = -(p0 * blp0 + (1.0 - p0) * blp1)

    # Select (not multiply) so NaN/Inf from unspecified over-run rows cannot leak.
    loss_m = jnp.where(valid, loss_elem, 0.0)
    ent_m = jnp.where(valid, ent_elem, 0.0)

    # Fold rows down to a lane-dense (8, N) slab using only VPU adds; the tiny
    # cross-lane/cross-sublane reduce + scaling is done in the wrapper.
    lsum = jnp.sum(loss_m.reshape(tile_b // 8, 8, n), axis=0)
    esum = jnp.sum(ent_m.reshape(tile_b // 8, 8, n), axis=0)
    out_ref[0:8, :] = lsum
    out_ref[8:16, :] = esum


# --------------------------------- wrapper -----------------------------------------

def _vmem_capacity_bytes():
    try:
        return int(pltpu.get_tpu_info().vmem_capacity_bytes)
    except Exception:
        return 64 * 1024 * 1024   # conservative (v7x-sized) fallback


def _pick_tile_b(b, n, h):
    cap = _vmem_capacity_bytes()
    # ~55% of physical VMEM for tensors: ~35 MiB on v7x (64 MiB), ~70 MiB on v5e/v6e (128 MiB).
    budget = int(cap * 0.55)
    # Double-buffered inputs (logits, bias f32; labels bf16; hidden f32) plus
    # ~16 f32 elementwise-chain temporaries of width N per row.
    per_row = 2 * (4 * n + 4 * n + 2 * n + 4 * h) + 16 * 4 * n
    tb = budget // per_row
    tb = max(_ROW_ALIGN, (tb // _ROW_ALIGN) * _ROW_ALIGN)
    # Keep >= ~4 grid tiles so the 'parallel' axis shards across v7x's two TensorCores.
    multi = max(_ROW_ALIGN, (b // 4 // _ROW_ALIGN) * _ROW_ALIGN)
    tb = min(tb, multi)
    # No point tiling beyond the (row-aligned) batch.
    tb = min(tb, ((b + _ROW_ALIGN - 1) // _ROW_ALIGN) * _ROW_ALIGN)
    return tb


def learned_mixin_h(logits, labels, bias, hidden, w_lin, b_lin,
                    smooth_param, constant_smooth=0.0, w=0.36, tile_b=None):
    """logits/labels/bias: (B,N); hidden: (B,H); w_lin: (H,); scalars python floats."""
    logits = jnp.asarray(logits, jnp.float32)
    labels = jnp.asarray(labels, jnp.bfloat16)   # HBM byte diet; exact for 0/1 labels
    bias = jnp.asarray(bias, jnp.float32)
    hidden = jnp.asarray(hidden, jnp.float32)
    B, N = logits.shape
    H = hidden.shape[1]

    if tile_b is None:
        tile_b = _pick_tile_b(B, N, H)
    tile_b = max(_ROW_ALIGN, (int(tile_b) // _ROW_ALIGN) * _ROW_ALIGN)

    # No wrapper-side padding: ragged last tile is handled by the in-kernel mask.
    num_tiles = pl.cdiv(B, tile_b)

    params = jnp.array([b_lin, smooth_param, constant_smooth], dtype=jnp.float32)
    nrows = jnp.array([B], dtype=jnp.int32)
    w_row = jnp.asarray(w_lin, jnp.float32).reshape(1, H)

    cap = _vmem_capacity_bytes()
    vmem_limit = min(int(cap * 0.70), cap - (4 << 20))

    partials = pl.pallas_call(
        _lmh_kernel,
        out_shape=jax.ShapeDtypeStruct((num_tiles * 16, N), jnp.float32),
        grid_spec=pltpu.PrefetchScalarGridSpec(
            num_scalar_prefetch=0,
            grid=(num_tiles,),
            in_specs=[
                pl.BlockSpec(memory_space=pltpu.MemorySpace.SMEM),   # params
                pl.BlockSpec(memory_space=pltpu.MemorySpace.SMEM),   # nrows
                pl.BlockSpec((tile_b, N), lambda i: (i, 0)),         # logits (f32)
                pl.BlockSpec((tile_b, N), lambda i: (i, 0)),         # labels (bf16)
                pl.BlockSpec((tile_b, N), lambda i: (i, 0)),         # bias   (f32)
                pl.BlockSpec((tile_b, H), lambda i: (i, 0)),         # hidden (f32)
                pl.BlockSpec((1, H), lambda i: (0, 0)),              # w_lin row
            ],
            out_specs=pl.BlockSpec((16, N), lambda i: (i, 0)),
        ),
        compiler_params=pltpu.CompilerParams(
            dimension_semantics=("parallel",),
            vmem_limit_bytes=vmem_limit),
    )(params, nrows, logits, labels, bias, hidden, w_row)

    # Tiny finalize in the XLA graph: reduce the per-tile (8,N) slabs, scale, combine.
    parts = partials.reshape(num_tiles, 2, 8, N)
    loss = jnp.sum(parts[:, 0]) / B
    entropy = jnp.sum(parts[:, 1]) / (B * N)
    return loss + jnp.float32(w) * entropy


# ------------------------------ plain-JAX reference --------------------------------

def _elementwise_logsumexp(a, b):
    return jnp.maximum(a, b) + jnp.log1p(jnp.exp(-jnp.abs(a - b)))


def _reference(logits, labels, bias, hidden, w_lin, b_lin, smooth_param,
               constant_smooth, w):
    factor = _softplus(jnp.sum(hidden * w_lin[None, :], axis=-1, keepdims=True) + b_lin)  # (B,1)
    soften = jax.nn.sigmoid(smooth_param)
    stacked = jnp.stack([bias, 1.0 - bias], axis=2) + constant_smooth + soften            # (B,N,2)
    bc = jnp.log(stacked) * factor[:, :, None]
    log_prob = -_softplus(-logits)
    log_probs = jnp.stack([log_prob, -logits + log_prob], axis=2)
    z = bc + log_probs
    norm = _elementwise_logsumexp(z[:, :, 0], z[:, :, 1])
    lp, lomp = z[:, :, 0] - norm, z[:, :, 1] - norm
    loss = (-(lp * labels + (1.0 - labels) * lomp)).sum(1).mean(0)
    bnorm = _elementwise_logsumexp(bc[:, :, 0], bc[:, :, 1])
    blp = bc - bnorm[:, :, None]
    entropy = -(jnp.exp(blp) * blp).sum(2).mean()
    return loss + w * entropy


# ------------------------------------- main -----------------------------------------

if __name__ == "__main__":
    # Small shapes; B=20 with auto tile_b (=16) exercises the ragged-tile mask and a 2-step grid.
    B, N, H = 20, 128, 128
    key = jax.random.PRNGKey(0)
    k1, k2, k3, k4, k5 = jax.random.split(key, 5)

    logits = jax.random.normal(k1, (B, N), jnp.float32)
    labels = (jax.random.uniform(k2, (B, N)) > 0.5).astype(jnp.float32)
    bias = jax.random.uniform(k3, (B, N), jnp.float32)                  # in [0,1)
    hidden = jax.random.normal(k4, (B, H), jnp.float32)

    # deterministic parameter init (synthetic): Linear(H,1) weight/bias, smooth_param
    w_lin = jax.random.normal(k5, (H,), jnp.float32) * 0.02
    b_lin = 0.0
    smooth_init = -1.0             # smooth_param initialized to smooth_init
    constant_smooth = 0.0
    w_penalty = 0.36

    out = learned_mixin_h(logits, labels, bias, hidden, w_lin, b_lin,
                          smooth_init, constant_smooth, w_penalty)
    out = jax.block_until_ready(out)

    ref = _reference(logits, labels, bias, hidden, w_lin, b_lin,
                     jnp.float32(smooth_init), constant_smooth, w_penalty)
    assert jnp.allclose(out, ref, rtol=1e-4, atol=1e-4), (out, ref)

    print("KERNEL_OK")
</pallas_src>

<mosaic_0001>
module attributes {stable_mosaic.version = 11 : i64} {
  func.func @_lmh_kernel(%arg0: i32, %arg1: memref<3xf32, #tpu.memory_space<smem>>, %arg2: memref<1xi32, #tpu.memory_space<smem>>, %arg3: memref<16x128xf32, #tpu.memory_space<vmem>>, %arg4: memref<16x128xbf16, #tpu.memory_space<vmem>>, %arg5: memref<16x128xf32, #tpu.memory_space<vmem>>, %arg6: memref<16x128xf32, #tpu.memory_space<vmem>>, %arg7: memref<1x128xf32, #tpu.memory_space<vmem>>, %arg8: memref<16x128xf32, #tpu.memory_space<vmem>>) attributes {dimension_semantics = [#tpu.dimension_semantics<parallel>], iteration_bounds = array<i64: 2>, scalar_prefetch = 0 : i64, scratch_operands = 0 : i64, tpu.core_type = #tpu.core_type<tc>, window_params = [{transform_indices = @transform_0, window_bounds = array<i64: 3>}, {transform_indices = @transform_1, window_bounds = array<i64: 1>}, {transform_indices = @transform_2, window_bounds = array<i64: 16, 128>}, {transform_indices = @transform_3, window_bounds = array<i64: 16, 128>}, {transform_indices = @transform_4, window_bounds = array<i64: 16, 128>}, {transform_indices = @transform_5, window_bounds = array<i64: 16, 128>}, {pipeline_mode = #tpu.pipeline_mode<synchronous>, transform_indices = @transform_6, window_bounds = array<i64: 1, 128>}, {transform_indices = @transform_7, window_bounds = array<i64: 16, 128>}]} {
    %c0 = arith.constant 0 : index
    %0 = memref.load %arg1[%c0] : memref<3xf32, #tpu.memory_space<smem>>
    %c1 = arith.constant 1 : index
    %1 = memref.load %arg1[%c1] : memref<3xf32, #tpu.memory_space<smem>>
    %c2 = arith.constant 2 : index
    %2 = memref.load %arg1[%c2] : memref<3xf32, #tpu.memory_space<smem>>
    %c0_0 = arith.constant 0 : index
    %3 = memref.load %arg2[%c0_0] : memref<1xi32, #tpu.memory_space<smem>>
    %c0_1 = arith.constant 0 : index
    %c0_2 = arith.constant 0 : index
    %4 = vector.load %arg3[%c0_1, %c0_2] : memref<16x128xf32, #tpu.memory_space<vmem>>, vector<16x128xf32>
    %c0_3 = arith.constant 0 : index
    %c0_4 = arith.constant 0 : index
    %5 = vector.load %arg4[%c0_3, %c0_4] : memref<16x128xbf16, #tpu.memory_space<vmem>>, vector<16x128xbf16>
    %6 = arith.extf %5 : vector<16x128xbf16> to vector<16x128xf32>
    %c0_5 = arith.constant 0 : index
    %c0_6 = arith.constant 0 : index
    %7 = vector.load %arg5[%c0_5, %c0_6] : memref<16x128xf32, #tpu.memory_space<vmem>>, vector<16x128xf32>
    %c0_7 = arith.constant 0 : index
    %c0_8 = arith.constant 0 : index
    %8 = vector.load %arg6[%c0_7, %c0_8] : memref<16x128xf32, #tpu.memory_space<vmem>>, vector<16x128xf32>
    %c0_9 = arith.constant 0 : index
    %c0_10 = arith.constant 0 : index
    %9 = vector.load %arg7[%c0_9, %c0_10] : memref<1x128xf32, #tpu.memory_space<vmem>>, vector<1x128xf32>
    %10 = tpu.iota {dimensions = array<i32: 0>} : vector<16x1xi32>
    %c16_i32 = arith.constant 16 : i32
    %11 = arith.muli %arg0, %c16_i32 : i32
    %12 = vector.broadcast %11 : i32 to vector<16x1xi32>
    %13 = arith.addi %10, %12 : vector<16x1xi32>
    %14 = vector.broadcast %3 : i32 to vector<16x1xi32>
    %15 = arith.cmpi slt, %13, %14 : vector<16x1xi32>
    %16 = vector.broadcast %9 : vector<1x128xf32> to vector<16x128xf32>
    %17 = arith.mulf %8, %16 : vector<16x128xf32>
    %cst = arith.constant dense<0.000000e+00> : vector<16xf32>
    %18 = vector.multi_reduction <add>, %17, %cst [1] : vector<16x128xf32> to vector<16xf32>
    %19 = vector.shape_cast %18 : vector<16xf32> to vector<16x1xf32>
    %20 = vector.broadcast %0 : f32 to vector<16x1xf32>
    %21 = arith.addf %19, %20 : vector<16x1xf32>
    %cst_11 = arith.constant 0.000000e+00 : f32
    %22 = vector.broadcast %cst_11 : f32 to vector<16x1xf32>
    %23 = arith.maximumf %21, %22 : vector<16x1xf32>
    %24 = math.absf %21 : vector<16x1xf32>
    %cst_12 = arith.constant 0.000000e+00 : f32
    %25 = vector.broadcast %cst_12 : f32 to vector<16x1xf32>
    %26 = arith.subf %25, %24 : vector<16x1xf32>
    %27 = math.exp %26 : vector<16x1xf32>
    %28 = math.log1p %27 : vector<16x1xf32>
    %29 = arith.addf %23, %28 : vector<16x1xf32>
    %cst_13 = arith.constant 0.000000e+00 : f32
    %30 = arith.subf %cst_13, %1 : f32
    %31 = math.exp %30 : f32
    %cst_14 = arith.constant 1.000000e+00 : f32
    %32 = arith.addf %cst_14, %31 : f32
    %cst_15 = arith.constant 1.000000e+00 : f32
    %33 = arith.divf %cst_15, %32 : f32
    %34 = arith.addf %2, %33 : f32
    %35 = vector.broadcast %34 : f32 to vector<16x128xf32>
    %36 = arith.addf %7, %35 : vector<16x128xf32>
    %37 = math.log %36 : vector<16x128xf32>
    %38 = vector.broadcast %29 : vector<16x1xf32> to vector<16x128xf32>
    %39 = arith.mulf %37, %38 : vector<16x128xf32>
    %cst_16 = arith.constant 1.000000e+00 : f32
    %40 = arith.addf %cst_16, %34 : f32
    %41 = vector.broadcast %40 : f32 to vector<16x128xf32>
    %42 = arith.subf %41, %7 : vector<16x128xf32>
    %43 = math.log %42 : vector<16x128xf32>
    %44 = vector.broadcast %29 : vector<16x1xf32> to vector<16x128xf32>
    %45 = arith.mulf %43, %44 : vector<16x128xf32>
    %cst_17 = arith.constant 0.000000e+00 : f32
    %46 = vector.broadcast %cst_17 : f32 to vector<16x128xf32>
    %47 = arith.subf %46, %4 : vector<16x128xf32>
    %cst_18 = arith.constant 0.000000e+00 : f32
    %48 = vector.broadcast %cst_18 : f32 to vector<16x128xf32>
    %49 = arith.maximumf %47, %48 : vector<16x128xf32>
    %50 = math.absf %47 : vector<16x128xf32>
    %cst_19 = arith.constant 0.000000e+00 : f32
    %51 = vector.broadcast %cst_19 : f32 to vector<16x128xf32>
    %52 = arith.subf %51, %50 : vector<16x128xf32>
    %53 = math.exp %52 : vector<16x128xf32>
    %54 = math.log1p %53 : vector<16x128xf32>
    %55 = arith.addf %49, %54 : vector<16x128xf32>
    %cst_20 = arith.constant 0.000000e+00 : f32
    %56 = vector.broadcast %cst_20 : f32 to vector<16x128xf32>
    %57 = arith.subf %56, %55 : vector<16x128xf32>
    %cst_21 = arith.constant 0.000000e+00 : f32
    %58 = vector.broadcast %cst_21 : f32 to vector<16x128xf32>
    %59 = arith.subf %58, %4 : vector<16x128xf32>
    %60 = arith.addf %59, %57 : vector<16x128xf32>
    %61 = arith.addf %39, %57 : vector<16x128xf32>
    %62 = arith.addf %45, %60 : vector<16x128xf32>
    %63 = arith.subf %61, %62 : vector<16x128xf32>
    %64 = math.absf %63 : vector<16x128xf32>
    %cst_22 = arith.constant 0.000000e+00 : f32
    %65 = vector.broadcast %cst_22 : f32 to vector<16x128xf32>
    %66 = arith.subf %65, %64 : vector<16x128xf32>
    %67 = math.exp %66 : vector<16x128xf32>
    %68 = arith.maximumf %61, %62 : vector<16x128xf32>
    %69 = math.log1p %67 : vector<16x128xf32>
    %70 = arith.addf %68, %69 : vector<16x128xf32>
    %71 = arith.subf %61, %70 : vector<16x128xf32>
    %72 = arith.subf %62, %70 : vector<16x128xf32>
    %73 = arith.subf %71, %72 : vector<16x128xf32>
    %74 = arith.mulf %6, %73 : vector<16x128xf32>
    %75 = arith.addf %72, %74 : vector<16x128xf32>
    %cst_23 = arith.constant 0.000000e+00 : f32
    %76 = vector.broadcast %cst_23 : f32 to vector<16x128xf32>
    %77 = arith.subf %76, %75 : vector<16x128xf32>
    %78 = arith.subf %39, %45 : vector<16x128xf32>
    %79 = math.absf %78 : vector<16x128xf32>
    %cst_24 = arith.constant 0.000000e+00 : f32
    %80 = vector.broadcast %cst_24 : f32 to vector<16x128xf32>
    %81 = arith.subf %80, %79 : vector<16x128xf32>
    %82 = math.exp %81 : vector<16x128xf32>
    %83 = arith.maximumf %39, %45 : vector<16x128xf32>
    %84 = math.log1p %82 : vector<16x128xf32>
    %85 = arith.addf %83, %84 : vector<16x128xf32>
    %86 = arith.subf %39, %85 : vector<16x128xf32>
    %87 = arith.subf %45, %85 : vector<16x128xf32>
    %cst_25 = arith.constant 1.000000e+00 : f32
    %88 = vector.broadcast %cst_25 : f32 to vector<16x128xf32>
    %89 = arith.addf %88, %82 : vector<16x128xf32>
    %90 = tpu.reciprocal %89 {approx = true} : vector<16x128xf32> -> vector<16x128xf32>
    %91 = arith.mulf %89, %90 : vector<16x128xf32>
    %cst_26 = arith.constant 2.000000e+00 : f32
    %92 = vector.broadcast %cst_26 : f32 to vector<16x128xf32>
    %93 = arith.subf %92, %91 : vector<16x128xf32>
    %94 = arith.mulf %90, %93 : vector<16x128xf32>
    %95 = arith.cmpf oge, %39, %45 : vector<16x128xf32>
    %96 = arith.mulf %82, %94 : vector<16x128xf32>
    %97 = arith.select %95, %94, %96 : vector<16x128xi1>, vector<16x128xf32>
    %98 = arith.mulf %97, %86 : vector<16x128xf32>
    %cst_27 = arith.constant 1.000000e+00 : f32
    %99 = vector.broadcast %cst_27 : f32 to vector<16x128xf32>
    %100 = arith.subf %99, %97 : vector<16x128xf32>
    %101 = arith.mulf %100, %87 : vector<16x128xf32>
    %102 = arith.addf %98, %101 : vector<16x128xf32>
    %cst_28 = arith.constant 0.000000e+00 : f32
    %103 = vector.broadcast %cst_28 : f32 to vector<16x128xf32>
    %104 = arith.subf %103, %102 : vector<16x128xf32>
    %cst_29 = arith.constant 0.000000e+00 : f32
    %105 = vector.shape_cast %15 : vector<16x1xi1> to vector<16x1xi1>
    %106 = vector.broadcast %105 : vector<16x1xi1> to vector<16x128xi1>
    %107 = vector.broadcast %cst_29 : f32 to vector<16x128xf32>
    %108 = arith.select %106, %77, %107 : vector<16x128xi1>, vector<16x128xf32>
    %cst_30 = arith.constant 0.000000e+00 : f32
    %109 = vector.shape_cast %15 : vector<16x1xi1> to vector<16x1xi1>
    %110 = vector.broadcast %109 : vector<16x1xi1> to vector<16x128xi1>
    %111 = vector.broadcast %cst_30 : f32 to vector<16x128xf32>
    %112 = arith.select %110, %104, %111 : vector<16x128xi1>, vector<16x128xf32>
    %113 = vector.shape_cast %108 : vector<16x128xf32> to vector<2x8x128xf32>
    %cst_31 = arith.constant dense<0.000000e+00> : vector<8x128xf32>
    %114 = vector.multi_reduction <add>, %113, %cst_31 [0] : vector<2x8x128xf32> to vector<8x128xf32>
    %115 = vector.shape_cast %112 : vector<16x128xf32> to vector<2x8x128xf32>
    %cst_32 = arith.constant dense<0.000000e+00> : vector<8x128xf32>
    %116 = vector.multi_reduction <add>, %115, %cst_32 [0] : vector<2x8x128xf32> to vector<8x128xf32>
    %c0_33 = arith.constant 0 : index
    %c0_34 = arith.constant 0 : index
    %117 = vector.load %arg8[%c0_33, %c0_34] : memref<16x128xf32, #tpu.memory_space<vmem>>, vector<8x128xf32>
    tpu.vector_store %arg8[%c0_33, %c0_34], %114 {strides = array<i32>} : memref<16x128xf32, #tpu.memory_space<vmem>>, vector<8x128xf32>,
    %c8 = arith.constant 8 : index
    %c0_35 = arith.constant 0 : index
    %118 = vector.load %arg8[%c8, %c0_35] : memref<16x128xf32, #tpu.memory_space<vmem>>, vector<8x128xf32>
    tpu.vector_store %arg8[%c8, %c0_35], %116 {strides = array<i32>} : memref<16x128xf32, #tpu.memory_space<vmem>>, vector<8x128xf32>,
    return
  }
  func.func @transform_0(%arg0: i32) -> i32 {
    %c0_i32 = arith.constant 0 : i32
    %c0_i32_0 = arith.constant 0 : i32
    return %c0_i32 : i32
  }
  func.func @transform_1(%arg0: i32) -> i32 {
    %c0_i32 = arith.constant 0 : i32
    %c0_i32_0 = arith.constant 0 : i32
    return %c0_i32 : i32
  }
  func.func @transform_2(%arg0: i32) -> (i32, i32) {
    %c0_i32 = arith.constant 0 : i32
    %c0_i32_0 = arith.constant 0 : i32
    return %arg0, %c0_i32 : i32, i32
  }
  func.func @transform_3(%arg0: i32) -> (i32, i32) {
    %c0_i32 = arith.constant 0 : i32
    %c0_i32_0 = arith.constant 0 : i32
    return %arg0, %c0_i32 : i32, i32
  }
  func.func @transform_4(%arg0: i32) -> (i32, i32) {
    %c0_i32 = arith.constant 0 : i32
    %c0_i32_0 = arith.constant 0 : i32
    return %arg0, %c0_i32 : i32, i32
  }
  func.func @transform_5(%arg0: i32) -> (i32, i32) {
    %c0_i32 = arith.constant 0 : i32
    %c0_i32_0 = arith.constant 0 : i32
    return %arg0, %c0_i32 : i32, i32
  }
  func.func @transform_6(%arg0: i32) -> (i32, i32) {
    %c0_i32 = arith.constant 0 : i32
    %c0_i32_0 = arith.constant 0 : i32
    %c0_i32_1 = arith.constant 0 : i32
    return %c0_i32, %c0_i32_0 : i32, i32
  }
  func.func @transform_7(%arg0: i32) -> (i32, i32) {
    %c0_i32 = arith.constant 0 : i32
    %c0_i32_0 = arith.constant 0 : i32
    return %arg0, %c0_i32 : i32, i32
  }
}

</mosaic_0001>

<bundles_post_ra>
// kernel: tpu_custom_call.1
= control target key start
LH: loop header
LB: loop body
LE: loop exit
PB: predicated region body
PF: predicated region fallthrough
CT: control target
= control target key end

     0   :  { %s1776_s0 = inlined_call_operand.vmem [shape: f32[3], index: 0, kind: input, shape index: {}]   ;;  %s1777_s1 = inlined_call_operand.<no memory space> [shape: s32[1], index: 1, kind: input, shape index: {}]   ;;  %s1778_s2 = inlined_call_operand.hbm [shape: f32[20,128], index: 2, kind: input, shape index: {}]   ;;  %s1779_s3 = inlined_call_operand.hbm [shape: bf16[20,128], index: 3, kind: input, shape index: {}]   ;;  %s1780_s4 = inlined_call_operand.hbm [shape: f32[20,128], index: 4, kind: input, shape index: {}]   ;;  %s1781_s5 = inlined_call_operand.hbm [shape: f32[20,128], index: 5, kind: input, shape index: {}]   ;;  %s1782_s6 = inlined_call_operand.vmem [shape: f32[1,128], index: 6, kind: input, shape index: {}]   ;;  %s1783_s7 = inlined_call_operand.hbm [shape: f32[32,128], index: 7, kind: output, shape index: {}]  }
   0x1   :  { %1788 = sst [smem:[#allocation20_spill]] %s1776_s0 }
   0x2   :  { %12 = sst [smem:[#allocation2]] %s1777_s1 }
   0x3   :  { %13 = vsyncpa [#allocation6], 0 }
   0x4   :  { %14 = vsyncpa [#allocation4], 0 }
   0x5   :  { %16 = vsyncpa [#allocation4 + $0x1], 0 }
   0x6   :  { %17 = vsyncpa [#allocation9], 0 }
   0x7   :  { %19 = vsyncpa [#allocation9 + $0x1], 0 }
   0x8   :  { %20 = vsyncpa [#allocation12], 0 }
   0x9   :  { %22 = vsyncpa [#allocation12 + $0x1], 0 }
   0xa   :  { %23 = vsyncpa [#allocation5], 0 }
   0xb   :  { %25 = vsyncpa [#allocation5 + $0x1], 0  ;;  %s1325_s26 = smov 0   ;;  %s1327_s27 = smov 0  }
   0xc   :  { %s1329_s28 = smov 0   ;;  %s1331_s29 = smov 0  }
   0xd LB: > { %s1346_s1 = sadd.s32 4294967295, %s1264_s29   ;;  %s896_s30 = sadd.s32 4294967294, %s1264_s29   ;;  %s1264_s29 = sphi %s1331_s29, %s1812_s29   ;;  %s1260_s28 = sphi %s1329_s28, %s1811_s28   ;;  %s1256_s27 = sphi %s1327_s27, %s1810_s27   ;;  %s1252_s26 = sphi %s1325_s26, %s1809_s26  }
   0xe   : > { %s1350_s8 = sadd.s32 1, %s1264_s29   ;;  %s80_s9 = sadd.s32 1, %s1260_s28 }
   0xf   : > { %s77_s10 = ssub.s32 %s1264_s29, %s1350_s8  ;;  %p87_p0 = scmp.ne.s32.totalorder %s1260_s28, %s1256_s27 }
  0x10   : > { %p78_p1 = scmp.eq.s32.totalorder %s77_s10, 0  ;;  %p88_p2 = scmp.eq.s32.totalorder %s1264_s29, 0 }
  0x11   : > { %p93_p3 = scmp.ne.s32.totalorder %s1256_s27, %s1252_s26  ;;  %p1787_p4 = scmp.eq.s32.totalorder %s1346_s1, 0 }
  0x12   : > { %s1362_s11 = scalar_select %p78_p1, %s1260_s28, %s80_s9  }
  0x13   : > { %p1364_p5 = por %p88_p2, %p87_p0  ;;  %p1370_p6 = por %p1787_p4, %p93_p3 }
  0x14   : > { %1789 = sst [smem:[#allocation19_spill]] %s1362_s11  ;;  %p216_p7 = scmp.eq.s32.totalorder %s1346_s1, 1 }
  0x15   : > { %s1791_s13 = scalar_select %p1370_p6, 1, 0 }
  0x16   : > { %p222_p8 = scmp.eq.s32.totalorder %s896_s30, 1  ;;  %p897_p9 = scmp.ge.s32.totalorder %s1264_s29, 1 }
  0x17   : > { %p229_p10 = scmp.lt.s32.totalorder %s1264_s29, 3  ;;  %p1377_p11 = por %p216_p7, %p87_p0 }
  0x18   : > { %p1381_p12 = por %p222_p8, %p93_p3  ;;  %s1795_s0 = sld [smem:[#allocation20_spill]] }
  0x19   : > { %s1792_s14 = scalar_select %p1377_p11, 1, 0 }
  0x1a   : > { %s1793_s15 = scalar_select %p1381_p12, 1, 0 }
  0x1b   : > { %p1385_p13 = pnand %p897_p9, %p229_p10 }
  0x1d   : > { %p967_p1 = pneg %p1385_p13 }
  0x1e   : > { %s242_s19 = sshll.u32 %s1795_s0, 4  ;;  %s243_s19 = int_to_ptr.vmem [resolvable:$true] %s242_s19 }
  0x1f   : > { %p968_p0 = pnand %p967_p1, %p1787_p4  ;;  %s1069_s20 = scalar_lea.vmem %s243_s19, 16 }
  0x20   : > { %p1070_p2 = scmp.ne.s32.totalorder %s243_s19, %s1069_s20  ;;  %p1077_p12 = scmp.lt.s32.totalorder %s243_s19, %s243_s19 }
  0x21   : > { %p1071_p3 = pneg %p968_p0  ;;  %p1078_p9 = scmp.lt.s32.totalorder %s1069_s20, %s1069_s20 }
  0x23   : > { %p1072_p7 = pnand %p1071_p3, %p1070_p2  ;;  %p1079_p10 = por %p1078_p9, %p1077_p12 }
  0x25   : > { %p1073_p8 = pneg %p1072_p7 }
  0x27   : > { %p1080_p11 = pnand %p1079_p10, %p1073_p8 }
  0x29   : > { %1083 = shalt.err (!%p1080_p11)
}
  0x2a   : > { %s1266_s21 = smov [#allocation3]   ;;  %p1786_p6 = scmp.ge.s32.totalorder %s1264_s29, 2 }
  0x2b   : > { %970 = dma.vmem_to_smem (!%p968_p0), %s243_s19, 16, %s1266_s21, [#allocation6]  }
  0x2c   : > { %255 = sbr.rel (%p1786_p6) target bundleno = 177 (0xb1), region = 28 }
  0x31   : > { %258 = sbr.rel (!%p1364_p5) target bundleno = 81 (0x51), region = 32  ;;  %s259_s22 = sand.u32 (%p1364_p5), 1, %s1260_s28  }
  0x32   : > { %s901_s23 = sshll.u32 (%p1364_p5), %s1264_s29, 1  ;;  %s900_s24 = sshll.u32 (%p1364_p5), %s259_s22, 4 }
  0x33   : > { %s265_s25 = ssub.s32 (%p1364_p5), 3, %s901_s23  ;;  %s1406_s10 = scalar_lea.sflag (%p1364_p5), [#allocation4], %s259_s22 }
  0x34   : > { %p266_p1 = scmp.lt.s32.totalorder (%p1364_p5), %s265_s25, 2  ;;  %s263_s17 = scalar_lea.vmem (%p1364_p5), [#allocation7], %s900_s24 }
  0x36   : > { %s1814_s25 = smov (!%p266_p1, %s265_s25), 2 }
  0x37   : > { %s1403_s30 = sshll.u32 %s1814_s25, 7 }
  0x38   : > { %s270_s9 = ssub.s32 256, %s1403_s30 }
  0x39   : > { %271 = vsyncadd %s1406_s10, %s270_s9  ;;  %p903_p11 = scmp.ne.s32.totalorder %s1403_s30, 0  ;;  %s944_s18 = sshll.u32 %s1264_s29, 8 }
  0x3a   : > { %s1414_s21 = scalar_lea.hbm %s1778_s2, %s944_s18  ;;  %s276_s23 = sshll.u32 %s263_s17, 4  ;;  %s1416_s23 = int_to_ptr.vmem [resolvable:$true] %s276_s23 }
  0x3b   : > { %s1084_s22 = scalar_lea.hbm %s1414_s21, %s1403_s30  ;;  %s1088_s9 = scalar_lea.hbm %s1778_s2, 384 }
  0x3c   : > { %p1085_p12 = scmp.ne.s32.totalorder %s1414_s21, %s1084_s22  ;;  %p1089_p3 = scmp.lt.s32.totalorder %s1414_s21, %s1778_s2 }
  0x3d   : > { %p1090_p7 = scmp.lt.s32.totalorder %s1088_s9, %s1084_s22 }
  0x3e   : > { %p1086_p0 = pnand %p1085_p12, %p903_p11 }
  0x3f   : > { %p1091_p8 = por %p1090_p7, %p1089_p3 }
  0x40   : > { %p1087_p2 = pneg %p1086_p0 }
  0x42   : > { %p1092_p9 = pnand %p1091_p8, %p1087_p2 }
  0x44   : > { %1095 = shalt.err (!%p1092_p9)
}
  0x45   : > { %s1096_s17 = scalar_lea.vmem %s1416_s23, %s1403_s30  ;;  %s1267_s18 = smov [#allocation7]  }
  0x46   : > { %p1097_p10 = scmp.ne.s32.totalorder %s1416_s23, %s1096_s17  ;;  %s1100_s19 = sshll.u32 %s1267_s18, 4  ;;  %s1101_s19 = int_to_ptr.vmem [resolvable:$false] %s1100_s19 }
  0x47   : > { %s1102_s20 = scalar_lea.vmem %s1101_s19, 512  ;;  %p1103_p0 = scmp.lt.s32.totalorder %s1416_s23, %s1101_s19 }
  0x48   : > { %p1098_p1 = pnand %p1097_p10, %p903_p11  ;;  %p1104_p6 = scmp.lt.s32.totalorder %s1102_s20, %s1096_s17 }
  0x4a   : > { %p1099_p12 = pneg %p1098_p1  ;;  %p1105_p4 = por %p1104_p6, %p1103_p0 }
  0x4c   : > { %p1106_p3 = pnand %p1105_p4, %p1099_p12 }
  0x4e   : > { %1109 = shalt.err (!%p1106_p3)
}
  0x4f   : > { %s1268_s0 = smov 128   ;;  %s1269_s11 = smov 8  }
  0x50   : > { %282 = dma.hbm_to_vmem [thread:$0]  (%p903_p11), %s1414_s21, %s1403_s30, %s1416_s23, %s1406_s10, %s1268_s0, %s1268_s0, %s1269_s11  }
  0x51 PF: > { %285 = sbr.rel (!%p1364_p5) target bundleno = 113 (0x71), region = 36  ;;  %s286_s22 = sand.u32 (%p1364_p5), 1, %s1264_s29  }
  0x52   : > { %s288_s24 = sand.u32 (%p1364_p5), 1, %s1260_s28   ;;  %s908_s9 = sshll.u32 (%p1364_p5), %s1264_s29, 1 }
  0x53   : > { %s907_s25 = sshll.u32 (%p1364_p5), %s288_s24, 3  ;;  %s292_s17 = ssub.s32 (%p1364_p5), 3, %s908_s9 }
  0x54   : > { %p293_p4 = scmp.lt.s32.totalorder (%p1364_p5), %s292_s17, 2  ;;  %s1450_s20 = scalar_lea.sflag (%p1364_p5), [#allocation9], %s286_s22 }
  0x55   : > { %s290_s30 = scalar_lea.vmem (%p1364_p5), [#allocation8], %s907_s25 }
  0x56   : > { %s1816_s17 = smov (!%p293_p4, %s292_s17), 2 }
  0x57   : > { %s1447_s18 = sshll.u32 %s1816_s17, 6 }
  0x58   : > { %s297_s19 = ssub.s32 128, %s1447_s18 }
  0x59   : > { %298 = vsyncadd %s1450_s20, %s297_s19  ;;  %p910_p6 = scmp.ne.s32.totalorder %s1447_s18, 0  ;;  %s945_s10 = sshll.u32 %s1264_s29, 7 }
  0x5a   : > { %s1458_s0 = scalar_lea.hbm %s1779_s3, %s945_s10  ;;  %s303_s11 = sshll.u32 %s290_s30, 4  ;;  %s1460_s11 = int_to_ptr.vmem [resolvable:$true] %s303_s11 }
  0x5b   : > { %s1110_s22 = scalar_lea.hbm %s1458_s0, %s1447_s18  ;;  %s1114_s9 = scalar_lea.hbm %s1779_s3, 192 }
  0x5c   : > { %p1111_p11 = scmp.ne.s32.totalorder %s1458_s0, %s1110_s22  ;;  %p1115_p8 = scmp.lt.s32.totalorder %s1458_s0, %s1779_s3 }
  0x5d   : > { %p1116_p9 = scmp.lt.s32.totalorder %s1114_s9, %s1110_s22 }
  0x5e   : > { %p1112_p2 = pnand %p1111_p11, %p910_p6 }
  0x5f   : > { %p1117_p10 = por %p1116_p9, %p1115_p8 }
  0x60   : > { %p1113_p7 = pneg %p1112_p2 }
  0x62   : > { %p1118_p1 = pnand %p1117_p10, %p1113_p7 }
  0x64   : > { %1121 = shalt.err (!%p1118_p1)
}
  0x65   : > { %s1122_s30 = scalar_lea.vmem %s1460_s11, %s1447_s18  ;;  %s1270_s10 = smov [#allocation8]  }
  0x66   : > { %p1123_p12 = scmp.ne.s32.totalorder %s1460_s11, %s1122_s30  ;;  %s1126_s21 = sshll.u32 %s1270_s10, 4  ;;  %s1127_s21 = int_to_ptr.vmem [resolvable:$false] %s1126_s21 }
  0x67   : > { %s1128_s23 = scalar_lea.vmem %s1127_s21, 256  ;;  %p1129_p4 = scmp.lt.s32.totalorder %s1460_s11, %s1127_s21 }
  0x68   : > { %p1124_p0 = pnand %p1123_p12, %p910_p6  ;;  %p1130_p11 = scmp.lt.s32.totalorder %s1128_s23, %s1122_s30 }
  0x6a   : > { %p1125_p3 = pneg %p1124_p0  ;;  %p1131_p2 = por %p1130_p11, %p1129_p4 }
  0x6c   : > { %p1132_p8 = pnand %p1131_p2, %p1125_p3 }
  0x6e   : > { %1135 = shalt.err (!%p1132_p8)
}
  0x6f   : > { %s1271_s22 = smov 64   ;;  %s1272_s24 = smov 4  }
  0x70   : > { %309 = dma.hbm_to_vmem [thread:$0]  (%p910_p6), %s1458_s0, %s1447_s18, %s1460_s11, %s1450_s20, %s1271_s22, %s1271_s22, %s1272_s24  }
  0x71 PF: > { %312 = sbr.rel (!%p1364_p5) target bundleno = 145 (0x91), region = 40  ;;  %s313_s25 = sand.u32 (%p1364_p5), 1, %s1264_s29  }
  0x72   : > { %s315_s9 = sand.u32 (%p1364_p5), 1, %s1260_s28   ;;  %s915_s19 = sshll.u32 (%p1364_p5), %s1264_s29, 1 }
  0x73   : > { %s914_s17 = sshll.u32 (%p1364_p5), %s315_s9, 4  ;;  %s319_s30 = ssub.s32 (%p1364_p5), 3, %s915_s19 }
  0x74   : > { %p320_p7 = scmp.lt.s32.totalorder (%p1364_p5), %s319_s30, 2  ;;  %s1494_s23 = scalar_lea.sflag (%p1364_p5), [#allocation9], %s313_s25 }
  0x75   : > { %s317_s18 = scalar_lea.vmem (%p1364_p5), [#allocation10], %s914_s17 }
  0x76   : > { %s1818_s30 = smov (!%p320_p7, %s319_s30), 2 }
  0x77   : > { %s1491_s10 = sshll.u32 %s1818_s30, 7 }
  0x78   : > { %s324_s21 = ssub.s32 256, %s1491_s10 }
  0x79   : > { %325 = vsyncadd %s1494_s23, %s324_s21  ;;  %p917_p6 = scmp.ne.s32.totalorder %s1491_s10, 0  ;;  %s946_s20 = sshll.u32 %s1264_s29, 8 }
  0x7a   : > { %s1502_s22 = scalar_lea.hbm %s1780_s4, %s946_s20  ;;  %s330_s24 = sshll.u32 %s317_s18, 4  ;;  %s1504_s24 = int_to_ptr.vmem [resolvable:$true] %s330_s24 }
  0x7b   : > { %s1136_s25 = scalar_lea.hbm %s1502_s22, %s1491_s10  ;;  %s1140_s19 = scalar_lea.hbm %s1780_s4, 384 }
  0x7c   : > { %p1137_p9 = scmp.ne.s32.totalorder %s1502_s22, %s1136_s25  ;;  %p1141_p12 = scmp.lt.s32.totalorder %s1502_s22, %s1780_s4 }
  0x7d   : > { %p1142_p0 = scmp.lt.s32.totalorder %s1140_s19, %s1136_s25 }
  0x7e   : > { %p1138_p10 = pnand %p1137_p9, %p917_p6 }
  0x7f   : > { %p1143_p3 = por %p1142_p0, %p1141_p12 }
  0x80   : > { %p1139_p1 = pneg %p1138_p10 }
  0x82   : > { %p1144_p4 = pnand %p1143_p3, %p1139_p1 }
  0x84   : > { %1147 = shalt.err (!%p1144_p4)
}
  0x85   : > { %s1148_s18 = scalar_lea.vmem %s1504_s24, %s1491_s10  ;;  %s1273_s20 = smov [#allocation10]  }
  0x86   : > { %p1149_p11 = scmp.ne.s32.totalorder %s1504_s24, %s1148_s18  ;;  %s1152_s0 = sshll.u32 %s1273_s20, 4  ;;  %s1153_s0 = int_to_ptr.vmem [resolvable:$false] %s1152_s0 }
  0x87   : > { %s1154_s11 = scalar_lea.vmem %s1153_s0, 512  ;;  %p1155_p7 = scmp.lt.s32.totalorder %s1504_s24, %s1153_s0 }
  0x88   : > { %p1150_p2 = pnand %p1149_p11, %p917_p6  ;;  %p1156_p9 = scmp.lt.s32.totalorder %s1154_s11, %s1148_s18 }
  0x8a   : > { %p1151_p8 = pneg %p1150_p2  ;;  %p1157_p10 = por %p1156_p9, %p1155_p7 }
  0x8c   : > { %p1158_p12 = pnand %p1157_p10, %p1151_p8 }
  0x8e   : > { %1161 = shalt.err (!%p1158_p12)
}
  0x8f   : > { %s1274_s25 = smov 128   ;;  %s1275_s9 = smov 8  }
  0x90   : > { %336 = dma.hbm_to_vmem [thread:$0]  (%p917_p6), %s1502_s22, %s1491_s10, %s1504_s24, %s1494_s23, %s1274_s25, %s1274_s25, %s1275_s9  }
  0x91 PF: > { %339 = sbr.rel (!%p1364_p5) target bundleno = 177 (0xb1), region = 44  ;;  %s340_s17 = sand.u32 (%p1364_p5), 1, %s1260_s28  }
  0x92   : > { %s922_s19 = sshll.u32 (%p1364_p5), %s1264_s29, 1  ;;  %s921_s30 = sshll.u32 (%p1364_p5), %s340_s17, 4 }
  0x93   : > { %s346_s21 = ssub.s32 (%p1364_p5), 3, %s922_s19  ;;  %s1537_s0 = scalar_lea.sflag (%p1364_p5), [#allocation12], %s340_s17 }
  0x94   : > { %p347_p1 = scmp.lt.s32.totalorder (%p1364_p5), %s346_s21, 2  ;;  %s344_s10 = scalar_lea.vmem (%p1364_p5), [#allocation11], %s921_s30 }
  0x96   : > { %s1820_s21 = smov (!%p347_p1, %s346_s21), 2 }
  0x97   : > { %s1534_s18 = sshll.u32 %s1820_s21, 7 }
  0x98   : > { %s351_s20 = ssub.s32 256, %s1534_s18 }
  0x99   : > { %352 = vsyncadd %s1537_s0, %s351_s20  ;;  %p924_p5 = scmp.ne.s32.totalorder %s1534_s18, 0  ;;  %s947_s12 = sshll.u32 %s1264_s29, 8 }
  0x9a   : > { %s1545_s24 = scalar_lea.hbm %s1781_s5, %s947_s12  ;;  %s357_s11 = sshll.u32 %s344_s10, 4  ;;  %s1547_s11 = int_to_ptr.vmem [resolvable:$true] %s357_s11 }
  0x9b   : > { %s1162_s25 = scalar_lea.hbm %s1545_s24, %s1534_s18  ;;  %s1166_s19 = scalar_lea.hbm %s1781_s5, 384 }
  0x9c   : > { %p1163_p6 = scmp.ne.s32.totalorder %s1545_s24, %s1162_s25  ;;  %p1167_p4 = scmp.lt.s32.totalorder %s1545_s24, %s1781_s5 }
  0x9d   : > { %p1168_p11 = scmp.lt.s32.totalorder %s1166_s19, %s1162_s25 }
  0x9e   : > { %p1164_p0 = pnand %p1163_p6, %p924_p5 }
  0x9f   : > { %p1169_p2 = por %p1168_p11, %p1167_p4 }
  0xa0   : > { %p1165_p3 = pneg %p1164_p0 }
  0xa2   : > { %p1170_p8 = pnand %p1169_p2, %p1165_p3 }
  0xa4   : > { %1173 = shalt.err (!%p1170_p8)
}
  0xa5   : > { %s1174_s20 = scalar_lea.vmem %s1547_s11, %s1534_s18  ;;  %s1276_s10 = smov [#allocation11]  }
  0xa6   : > { %p1175_p7 = scmp.ne.s32.totalorder %s1547_s11, %s1174_s20  ;;  %s1178_s12 = sshll.u32 %s1276_s10, 4  ;;  %s1179_s12 = int_to_ptr.vmem [resolvable:$false] %s1178_s12 }
  0xa7   : > { %s1180_s23 = scalar_lea.vmem %s1179_s12, 512  ;;  %p1181_p12 = scmp.lt.s32.totalorder %s1547_s11, %s1179_s12 }
  0xa8   : > { %p1176_p9 = pnand %p1175_p7, %p924_p5  ;;  %p1182_p1 = scmp.lt.s32.totalorder %s1180_s23, %s1174_s20 }
  0xaa   : > { %p1177_p10 = pneg %p1176_p9  ;;  %p1183_p6 = por %p1182_p1, %p1181_p12 }
  0xac   : > { %p1184_p0 = pnand %p1183_p6, %p1177_p10 }
  0xae   : > { %1187 = shalt.err (!%p1184_p0)
}
  0xaf   : > { %s1277_s22 = smov 128   ;;  %s1278_s25 = smov 8  }
  0xb0   : > { %363 = dma.hbm_to_vmem [thread:$0]  (%p924_p5), %s1545_s24, %s1534_s18, %s1547_s11, %s1537_s0, %s1277_s22, %s1277_s22, %s1278_s25  }
  0xb1 PF: > { %369 = sbr.rel (%p1385_p13) target bundleno = 461 (0x1cd), region = 48  ;;  %p1796_p3 = scmp.eq.s32.totalorder (!%p1385_p13), %s1346_s1, 0 }
  0xb6   : > { %1231 = dma.done.wait (%p1796_p3), [#allocation6], 16   ;;  %p1797_p4 = pmov %p1796_p3 }
  0xb7   : > { %s1580_s9 = sand.u32 1, %s1256_s27   ;;  %p1798_p5 = scmp.ne.s32.totalorder %s1791_s13, 0 }
  0xb8   : > { %1233 = vsyncadd (%p1797_p4), [#allocation6], 4294967280  ;;  %s1583_s17 = sshll.u32 %s1580_s9, 4  ;;  %s376_s18 = scalar_lea.sflag [#allocation4], %s1580_s9 }
  0xb9   : > { %s379_s0 = scalar_lea.vmem [#allocation7], %s1583_s17 }
  0xba   : > { %1235 = dma.done.wait (%p1798_p5), %s376_s18, 256  }
  0xbb   : > { %1237 = vsyncadd (%p1798_p5), %s376_s18, 4294967040  ;;  %s384_s16 = sand.u32 1, %s1346_s1   ;;  %s931_s24 = sshll.u32 %s1580_s9, 3 }
  0xbc   : > { %s385_s11 = scalar_lea.sflag [#allocation9], %s384_s16  ;;  %s1593_s19 = scalar_lea.vmem [#allocation8], %s931_s24 }
  0xbd   : > { %1239 = dma.done.wait (%p1798_p5), %s385_s11, 384  }
  0xbe   : > { %1241 = vsyncadd (%p1798_p5), %s385_s11, 4294966912  ;;  %s397_s30 = scalar_lea.vmem [#allocation10], %s1583_s17  ;;  %s403_s21 = scalar_lea.sflag [#allocation12], %s1580_s9 }
  0xbf   : > { %s406_s20 = scalar_lea.vmem [#allocation11], %s1583_s17 }
  0xc0   : > { %1243 = dma.done.wait (%p1798_p5), %s403_s21, 256  }
  0xc1   : > { %1245 = vsyncadd (%p1798_p5), %s403_s21, 4294967040 }
  0xc2   : > { %411 = sfence }
  0xc3   : > { %v486_v0 = vld [vmem:[%s406_s20] sm:$0xff]  ;;  %v487_v2 = vld [vmem:[%s406_s20 + $0x8] sm:$0xff]  ;;  %s935_s23 = sld [smem:[#allocation3 + $0x1]]  ;;  %v478_v10 = vld [vmem:[%s379_s0] sm:$0xff]  ;;  %s948_s21 = sshll.u32 %s1346_s1, 8 }
  0xc4   : > { %v938_v1 = vld [vmem:[%s1782_s6] ss:$0 sm:$0xff]  ;;  %v1611_v11 = vsub.f32 0.0, %v478_v10  ;;  %v479_v12 = vld [vmem:[%s379_s0 + $0x8] sm:$0xff]  ;;  %s474_s18 = sld [smem:[#allocation3]]  ;;  %v485_v40 = vld [vmem:[%s397_s30 + $0x8] sm:$0xff] }
  0xc5   : > { %v505_v3 = vmul.f32 %v938_v1, %v486_v0  ;;  %v506_v4 = vmul.f32 %v938_v1, %v487_v2  ;;  %v1615_v13 = vsub.f32 0.0, %v479_v12  ;;  %s936_s16 = sld [smem:[#allocation3 + $0x2]]  ;;  %v484_v35 = vld [vmem:[%s397_s30] sm:$0xff]  ;;  %s937_s30 = sshll.u32 %s1346_s1, 4 }
  0xc6   : > { %v577_v14 = vand.u32 2147483647, %v1611_v11  ;;  %v575_v57 = vmax.f32 %v1611_v11, 0.0  ;;  %s452_s20 = scalar_lea.vmem [#allocation13], %s1583_s17  ;;  %s732_s1 = scalar_lea.sflag [#allocation5], %s1580_s9 }
  0xc7   : > { %507 = vadd.xlane.f32.xlu0 %v505_v3  ;;  %v578_v15 = vand.u32 2147483647, %v1615_v13  ;;  %v576_v62 = vmax.f32 %v1615_v13, 0.0  ;;  %s745_s10 = sshll.u32 %s452_s20, 4  ;;  %p1805_p11 = scmp.ne.s32.totalorder %s1792_s14, 0  ;;  %s1733_s10 = int_to_ptr.vmem [resolvable:$true] %s745_s10 }
  0xc8   : > { %v579_v16 = vsub.f32 0.0, %v577_v14  ;;  %s1188_s17 = scalar_lea.vmem %s1733_s10, 256 }
  0xc9   : > { %s544_s22 = ssub.f32 0.0, %s935_s23  ;;  %v580_v17 = vsub.f32 0.0, %v578_v15  ;;  %p1189_p13 = scmp.ne.s32.totalorder %s1733_s10, %s1188_s17 }
  0xca   : > { %v581_v18 = vmul.f32 1.442695, %v579_v16  ;;  %v511_v20 = vstv %s474_s18 }
  0xcb   : > { %509 = vadd.xlane.f32.xlu0 %v506_v4  ;;  %v545_v5 = vstv %s544_s22  ;;  %v583_v19 = vmul.f32 1.442695, %v580_v17  ;;  %s1731_s22 = scalar_lea.hbm %s1783_s7, %s948_s21  ;;  %p1190_p2 = pnand %p1189_p13, %p1805_p11 }
  0xcc   : > { %v546_v6 = vmul.f32 1.442695, %v545_v5 }
  0xcd   : > { %p1191_p8 = pneg %p1190_p2 }
  0xce   : > { %1021 = vpow2.f32 %v546_v6 }
  0xdb   : > { %v1022_v7 = vpop.eup %1021 }
  0xdc   : > { %953 = vpush %v1022_v7 }
 0x10d   : > { %s954_s13 = spop %953 }
 0x10e   : > { %s549_s25 = sadd.f32 1.0, %s954_s13  ;;  %s1279_s13 = smov [#allocation13]  }
 0x110   : > { %v550_v8 = vstv %s549_s25  ;;  %s1192_s25 = sshll.u32 %s1279_s13, 4  ;;  %s1193_s25 = int_to_ptr.vmem [resolvable:$false] %s1192_s25 }
 0x111   : > { %1023 = vrcp.f32 %v550_v8  ;;  %s1194_s18 = scalar_lea.vmem %s1193_s25, 512  ;;  %p1195_p7 = scmp.lt.s32.totalorder %s1733_s10, %s1193_s25 }
 0x112   : > { %1025 = vpow2.f32 %v581_v18  ;;  %p1196_p9 = scmp.lt.s32.totalorder %s1194_s18, %s1188_s17 }
 0x113   : > { %1027 = vpow2.f32 %v583_v19 }
 0x114   : > { %p1197_p10 = por %p1196_p9, %p1195_p7 }
 0x116   : > { %p1198_p12 = pnand %p1197_p10, %p1191_p8 }
 0x11e   : > { %v1024_v9 = vpop.eup %1023 }
 0x11f   : > { %955 = vpush %v1024_v9  ;;  %v1026_v23 = vpop.eup %1025 }
 0x120   : > { %v585_v28 = vadd.f32 1.0, %v1026_v23  ;;  %v1028_v29 = vpop.eup %1027  ;;  %v588_v39 = vmul.f32 -0.5, %v1026_v23  ;;  %v591_v49 = vand.u32 2147483647, %v1026_v23 }
 0x121   : > { %v594_v33 = vadd.f32 1.0, %v1028_v29  ;;  %v597_v43 = vmul.f32 -0.5, %v1028_v29  ;;  %v600_v56 = vand.u32 2147483647, %v1028_v29 }
 0x122   : > { %v589_v47 = vadd.f32 1.0, %v588_v39  ;;  %vm592_vm0 = vcmp.lt.f32.partialorder %v591_v49, 0.0004427343 }
 0x123   : > { %v598_v52 = vadd.f32 1.0, %v597_v43  ;;  %vm601_vm1 = vcmp.lt.f32.partialorder %v600_v56, 0.0004427343 }
 0x124   : > { %v590_v55 = vmul.f32 %v1026_v23, %v589_v47 }
 0x125   : > { %v599_v59 = vmul.f32 %v1028_v29, %v598_v52 }
 0x150   : > { %v508_v21 = vpop.xlane.xlu0 %507  ;;  %s956_s0 = spop %955 }
 0x151   : > { %v1619_v22 = vadd.f32 %v511_v20, %v508_v21  ;;  %s553_s24 = sadd.f32 %s956_s0, %s936_s16 }
 0x153   : > { %v516_v24 = vand.u32 2147483647, %v1619_v22  ;;  %s563_s11 = sadd.f32 1.0, %s553_s24  ;;  %v554_v36 = vstv %s553_s24  ;;  %v514_v8 = vmax.f32 %v1619_v22, 0.0 }
 0x154   : > { %v510_v25 = vpop.xlane.xlu0 %509  ;;  %v555_v38 = vadd.f32 %v554_v36, %v484_v35  ;;  %v556_v46 = vadd.f32 %v554_v36, %v485_v40 }
 0x155   : > { %v518_v26 = vsub.f32 0.0, %v516_v24  ;;  %v1622_v27 = vadd.f32 %v511_v20, %v510_v25  ;;  %v564_v37 = vstv %s563_s11 }
 0x156   : > { %v565_v41 = vsub.f32 %v564_v37, %v484_v35  ;;  %v566_v48 = vsub.f32 %v564_v37, %v485_v40 }
 0x157   : > { %v520_v30 = vmul.f32 1.442695, %v518_v26  ;;  %v517_v31 = vand.u32 2147483647, %v1622_v27  ;;  %v515_v26 = vmax.f32 %v1622_v27, 0.0 }
 0x159   : > { %1029 = vpow2.f32 %v520_v30  ;;  %v519_v32 = vsub.f32 0.0, %v517_v31 }
 0x15a   : > { %1031 = vlog2.f32 %v585_v28 }
 0x15b   : > { %v522_v34 = vmul.f32 1.442695, %v519_v32 }
 0x15d   : > { %1033 = vpow2.f32 %v522_v34 }
 0x15e   : > { %1035 = vlog2.f32 %v594_v33 }
 0x15f   : > { %1037 = vlog2.f32 %v555_v38 }
 0x160   : > { %1039 = vlog2.f32 %v565_v41 }
 0x166   : > { %v1030_v42 = vpop.eup %1029 }
 0x167   : > { %v1032_v44 = vpop.eup %1031  ;;  %v524_v45 = vadd.f32 1.0, %v1030_v42  ;;  %v527_v60 = vmul.f32 -0.5, %v1030_v42  ;;  %v530_v4 = vand.u32 2147483647, %v1030_v42 }
 0x168   : > { %v587_v51 = vmul.f32 0.6931472, %v1032_v44 }
 0x169   : > { %1041 = vlog2.f32 %v524_v45  ;;  %v528_v1 = vadd.f32 1.0, %v527_v60  ;;  %vm531_vm2 = vcmp.lt.f32.partialorder %v530_v4, 0.0004427343 }
 0x16a   : > { %v1034_v50 = vpop.eup %1033  ;;  %1043 = vlog2.f32 %v556_v46  ;;  %v593_v61 = vsel %vm592_vm0, %v590_v55, %v587_v51 }
 0x16b   : > { %v1036_v53 = vpop.eup %1035  ;;  %v533_v54 = vadd.f32 1.0, %v1034_v50  ;;  %1045 = vlog2.f32 %v566_v48  ;;  %v603_v0 = vadd.f32 %v593_v61, %v575_v57  ;;  %v536_v2 = vmul.f32 -0.5, %v1034_v50 }
 0x16c   : > { %v596_v58 = vmul.f32 0.6931472, %v1036_v53  ;;  %v1038_v3 = vpop.eup %1037  ;;  %v529_v12 = vmul.f32 %v1030_v42, %v528_v1  ;;  %v539_v17 = vand.u32 2147483647, %v1034_v50 }
 0x16d   : > { %1047 = vlog2.f32 %v533_v54  ;;  %v1040_v5 = vpop.eup %1039  ;;  %v605_v9 = vsub.f32 0.0, %v603_v0  ;;  %v537_v14 = vadd.f32 1.0, %v536_v2  ;;  %v558_v15 = vmul.f32 0.6931472, %v1038_v3  ;;  %v1671_v2 = vld [vmem:[%s1593_s19] sm:$0xff]   ;;  %s1691_s19 = sld [smem:[#allocation2]] }
 0x16e   : > { %v602_v63 = vsel %vm601_vm1, %v599_v59, %v596_v58  ;;  %v568_v18 = vmul.f32 0.6931472, %v1040_v5  ;;  %vm540_vm3 = vcmp.lt.f32.partialorder %v539_v17, 0.0004427343  ;;  %v489_v0 = vlaneseq }
 0x16f   : > { %v604_v6 = vadd.f32 %v602_v63, %v576_v62  ;;  %v607_v25 = vadd.f32 %v605_v9, %v1611_v11  ;;  %v538_v22 = vmul.f32 %v1034_v50, %v537_v14 }
 0x171   : > { %v606_v21 = vsub.f32 0.0, %v604_v6  ;;  %v490_v6 = vshrl.u32 %v489_v0, 7 }
 0x173   : > { %v608_v34 = vadd.f32 %v606_v21, %v1615_v13  ;;  %v491_v17 = vadd.s32 8, %v490_v6 }
 0x176   : > { %v1042_v7 = vpop.eup %1041 }
 0x177   : > { %v526_v10 = vmul.f32 0.6931472, %v1042_v7  ;;  %v1044_v16 = vpop.eup %1043 }
 0x178   : > { %v1046_v19 = vpop.eup %1045  ;;  %v560_v33 = vmul.f32 0.6931472, %v1044_v16  ;;  %v952_v16 = vunpack.c.h.bf16 %v1671_v2 }
 0x179   : > { %v532_v20 = vsel %vm531_vm2, %v529_v12, %v526_v10  ;;  %v570_v30 = vmul.f32 0.6931472, %v1046_v19 }
 0x17a   : > { %v1048_v23 = vpop.eup %1047  ;;  %v542_v24 = vadd.f32 %v532_v20, %v514_v8 }
 0x17b   : > { %v535_v28 = vmul.f32 0.6931472, %v1048_v23 }
 0x17c   : > { %v1634_v29 = vmul.f32 %v558_v15, %v542_v24  ;;  %v1636_v31 = vmul.f32 %v568_v18, %v542_v24 }
 0x17d   : > { %v541_v32 = vsel %vm540_vm3, %v538_v22, %v535_v28 }
 0x17e   : > { %v543_v35 = vadd.f32 %v541_v32, %v515_v26  ;;  %v1640_v36 = vadd.f32 %v605_v9, %v1634_v29  ;;  %v1643_v11 = vadd.f32 %v607_v25, %v1636_v31  ;;  %v657_v27 = vsub.f32 %v1634_v29, %v1636_v31 }
 0x17f   : > { %v951_v9 = vunpack.c.l.bf16 %v1671_v2  ;;  %vm703_vm8 = vcmp.ge.f32.partialorder %v1634_v29, %v1636_v31 }
 0x180   : > { %v1647_v37 = vmul.f32 %v560_v33, %v543_v35  ;;  %v1649_v38 = vmul.f32 %v570_v30, %v543_v35  ;;  %v613_v39 = vsub.f32 %v1640_v36, %v1643_v11  ;;  %v659_v40 = vand.u32 2147483647, %v657_v27 }
 0x181   : > { %v623_v26 = vmax.f32 %v1640_v36, %v1643_v11 }
 0x182   : > { %v1654_v13 = vadd.f32 %v606_v21, %v1647_v37  ;;  %v1657_v41 = vadd.f32 %v608_v34, %v1649_v38  ;;  %v615_v42 = vand.u32 2147483647, %v613_v39  ;;  %v658_v43 = vsub.f32 %v1647_v37, %v1649_v38 }
 0x183   : > { %v661_v44 = vsub.f32 0.0, %v659_v40  ;;  %vm704_vm9 = vcmp.ge.f32.partialorder %v1647_v37, %v1649_v38 }
 0x184   : > { %v614_v45 = vsub.f32 %v1654_v13, %v1657_v41  ;;  %v617_v46 = vsub.f32 0.0, %v615_v42  ;;  %v660_v47 = vand.u32 2147483647, %v658_v43  ;;  %v624_v28 = vmax.f32 %v1654_v13, %v1657_v41 }
 0x185   : > { %v663_v48 = vmul.f32 1.442695, %v661_v44 }
 0x186   : > { %v616_v49 = vand.u32 2147483647, %v614_v45  ;;  %v619_v50 = vmul.f32 1.442695, %v617_v46  ;;  %v662_v51 = vsub.f32 0.0, %v660_v47 }
 0x187   : > { %1049 = vpow2.f32 %v663_v48 }
 0x188   : > { %v618_v52 = vsub.f32 0.0, %v616_v49  ;;  %1051 = vpow2.f32 %v619_v50  ;;  %v665_v53 = vmul.f32 1.442695, %v662_v51 }
 0x18a   : > { %v621_v54 = vmul.f32 1.442695, %v618_v52  ;;  %1053 = vpow2.f32 %v665_v53  ;;  %v667_v52 = vmax.f32 %v1634_v29, %v1636_v31  ;;  %v668_v53 = vmax.f32 %v1647_v37, %v1649_v38 }
 0x18c   : > { %1055 = vpow2.f32 %v621_v54 }
 0x194   : > { %v1663_v55 = vpop.eup %1049 }
 0x195   : > { %v1052_v56 = vpop.eup %1051  ;;  %v669_v57 = vadd.f32 1.0, %v1663_v55  ;;  %v672_v1 = vmul.f32 -0.5, %v1663_v55  ;;  %v675_v12 = vand.u32 2147483647, %v1663_v55 }
 0x196   : > { %v625_v58 = vadd.f32 1.0, %v1052_v56  ;;  %v628_v63 = vmul.f32 -0.5, %v1052_v56  ;;  %v631_v7 = vand.u32 2147483647, %v1052_v56 }
 0x197   : > { %v1666_v59 = vpop.eup %1053  ;;  %1057 = vlog2.f32 %v669_v57  ;;  %v673_v10 = vadd.f32 1.0, %v672_v1  ;;  %vm1683_vm5 = vcmp.lt.f32.partialorder %v675_v12, 0.0004427343 }
 0x198   : > { %1059 = vlog2.f32 %v625_v58  ;;  %v678_v60 = vadd.f32 1.0, %v1666_v59  ;;  %v681_v3 = vmul.f32 -0.5, %v1666_v59  ;;  %v629_v4 = vadd.f32 1.0, %v628_v63 }
 0x199   : > { %v1056_v61 = vpop.eup %1055  ;;  %1061 = vrcp.f32 %v669_v57  ;;  %v684_v14 = vand.u32 2147483647, %v1666_v59  ;;  %vm632_vm4 = vcmp.lt.f32.partialorder %v631_v7, 0.0004427343  ;;  %v674_v33 = vmul.f32 %v1663_v55, %v673_v10 }
 0x19a   : > { %v634_v62 = vadd.f32 1.0, %v1056_v61  ;;  %1063 = vlog2.f32 %v678_v60  ;;  %v637_v5 = vmul.f32 -0.5, %v1056_v61  ;;  %v640_v18 = vand.u32 2147483647, %v1056_v61 }
 0x19b   : > { %v682_v19 = vadd.f32 1.0, %v681_v3  ;;  %v630_v23 = vmul.f32 %v1052_v56, %v629_v4  ;;  %vm1687_vm6 = vcmp.lt.f32.partialorder %v684_v14, 0.0004427343  ;;  %v496_v7 = vstv %s1691_s19 }
 0x19c   : > { %1065 = vlog2.f32 %v634_v62  ;;  %v638_v24 = vadd.f32 1.0, %v637_v5  ;;  %vm641_vm7 = vcmp.lt.f32.partialorder %v640_v18, 0.0004427343 }
 0x19d   : > { %1067 = vrcp.f32 %v678_v60  ;;  %v683_v42 = vmul.f32 %v1666_v59, %v682_v19 }
 0x19e   : > { %v639_v46 = vmul.f32 %v1056_v61, %v638_v24 }
 0x1a4   : > { %v1058_v8 = vpop.eup %1057 }
 0x1a5   : > { %v1060_v15 = vpop.eup %1059  ;;  %v671_v25 = vmul.f32 0.6931472, %v1058_v8 }
 0x1a6   : > { %v1062_v20 = vpop.eup %1061  ;;  %v627_v21 = vmul.f32 0.6931472, %v1060_v15 }
 0x1a7   : > { %v697_v22 = vmul.f32 %v1062_v20, %v669_v57  ;;  %v1064_v30 = vpop.eup %1063  ;;  %v677_v47 = vsel %vm1683_vm5, %v674_v33, %v671_v25  ;;  %v493_v57 = vstv %s937_s30 }
 0x1a8   : > { %v633_v32 = vsel %vm632_vm4, %v630_v23, %v627_v21  ;;  %v680_v40 = vmul.f32 0.6931472, %v1064_v30  ;;  %v494_v3 = vadd.s32 %v493_v57, %v490_v6  ;;  %v495_v4 = vadd.s32 %v493_v57, %v491_v17 }
 0x1a9   : > { %v1066_v27 = vpop.eup %1065  ;;  %v643_v39 = vadd.f32 %v633_v32, %v623_v26  ;;  %v699_v43 = vsub.f32 2.0, %v697_v22 }
 0x1aa   : > { %v1068_v44 = vpop.eup %1067  ;;  %v636_v45 = vmul.f32 0.6931472, %v1066_v27  ;;  %v686_v50 = vsel %vm1687_vm6, %v683_v42, %v680_v40  ;;  %vm1718_vm10 = vcmp.lt.s32.totalorder %v494_v3, %v496_v7  ;;  %vm498_vm11 = vcmp.lt.s32.totalorder %v495_v4, %v496_v7 }
 0x1ab   : > { %v645_v48 = vsub.f32 %v1640_v36, %v643_v39  ;;  %v647_v49 = vsub.f32 %v1643_v11, %v643_v39  ;;  %v698_v51 = vmul.f32 %v1068_v44, %v678_v60  ;;  %v701_v56 = vmul.f32 %v1062_v20, %v699_v43 }
 0x1ac   : > { %v642_v54 = vsel %vm641_vm7, %v639_v46, %v636_v45  ;;  %v687_v36 = vadd.f32 %v677_v47, %v667_v52  ;;  %v688_v11 = vadd.f32 %v686_v50, %v668_v53 }
 0x1ad   : > { %v644_v58 = vadd.f32 %v642_v54, %v624_v28  ;;  %v649_v61 = vsub.f32 %v645_v48, %v647_v49  ;;  %v700_v62 = vsub.f32 2.0, %v698_v51  ;;  %v705_v60 = vmul.f32 %v1663_v55, %v701_v56 }
 0x1ae   : > { %v689_v14 = vsub.f32 %v1634_v29, %v687_v36  ;;  %v691_v55 = vsub.f32 %v1636_v31, %v687_v36  ;;  %v692_v6 = vsub.f32 %v1649_v38, %v688_v11 }
 0x1af   : > { %v646_v63 = vsub.f32 %v1654_v13, %v644_v58  ;;  %v648_v0 = vsub.f32 %v1657_v41, %v644_v58  ;;  %v651_v1 = vmul.f32 %v951_v9, %v649_v61  ;;  %v702_v2 = vmul.f32 %v1068_v44, %v700_v62 }
 0x1b0   : > { %v707_v5 = vsel %vm703_vm8, %v701_v56, %v705_v60  ;;  %v690_v41 = vsub.f32 %v1647_v37, %v688_v11 }
 0x1b1   : > { %v650_v8 = vsub.f32 %v646_v63, %v648_v0  ;;  %v653_v10 = vadd.f32 %v651_v1, %v647_v49  ;;  %v706_v12 = vmul.f32 %v1666_v59, %v702_v2  ;;  %v711_v13 = vsub.f32 1.0, %v707_v5 }
 0x1b2   : > { %v709_v17 = vmul.f32 %v707_v5, %v689_v14 }
 0x1b3   : > { %v652_v15 = vmul.f32 %v952_v16, %v650_v8  ;;  %v708_v9 = vsel %vm704_vm9, %v702_v2, %v706_v12  ;;  %v713_v19 = vmul.f32 %v711_v13, %v691_v55  ;;  %v655_v29 = vsub.f32 0.0, %v653_v10 }
 0x1b4   : > { %v712_v18 = vsub.f32 1.0, %v708_v9  ;;  %v710_v31 = vmul.f32 %v708_v9, %v690_v41 }
 0x1b5   : > { %v654_v20 = vadd.f32 %v652_v15, %v648_v0  ;;  %v715_v16 = vadd.f32 %v713_v19, %v709_v17  ;;  %v723_v38 = vsel %vm1718_vm10, %v655_v29, 0.0 }
 0x1b6   : > { %v714_v21 = vmul.f32 %v712_v18, %v692_v6 }
 0x1b7   : > { %v656_v23 = vsub.f32 0.0, %v654_v20  ;;  %v717_v24 = vsub.f32 0.0, %v715_v16 }
 0x1b8   : > { %v716_v37 = vadd.f32 %v714_v21, %v710_v31 }
 0x1b9   : > { %v724_v25 = vsel %vm498_vm11, %v656_v23, 0.0  ;;  %v725_v22 = vsel %vm1718_vm10, %v717_v24, 0.0 }
 0x1ba   : > { %v718_v26 = vsub.f32 0.0, %v716_v37  ;;  %v727_v28 = vadd.f32 %v724_v25, %v723_v38 }
 0x1bc   : > { %v726_v30 = vsel %vm498_vm11, %v718_v26, 0.0  ;;  %729 = vst [vmem:[%s452_s20] sm:$0xff] %v727_v28 }
 0x1bd   : > { %v728_v32 = vadd.f32 %v726_v30, %v725_v22 }
 0x1bf   : > { %730 = vst [vmem:[%s452_s20 + $0x8] sm:$0xff] %v728_v32 }
 0x1c0   : > { %1201 = shalt.err (!%p1198_p12)
}
 0x1c1   : > { %s1202_s16 = scalar_lea.hbm %s1731_s22, 256  ;;  %s1206_s11 = scalar_lea.hbm %s1783_s7, 512 }
 0x1c2   : > { %p1203_p1 = scmp.ne.s32.totalorder %s1731_s22, %s1202_s16  ;;  %p1207_p3 = scmp.lt.s32.totalorder %s1731_s22, %s1783_s7 }
 0x1c3   : > { %p1208_p4 = scmp.lt.s32.totalorder %s1206_s11, %s1202_s16 }
 0x1c4   : > { %p1204_p6 = pnand %p1203_p1, %p1805_p11 }
 0x1c5   : > { %p1209_p5 = por %p1208_p4, %p1207_p3 }
 0x1c6   : > { %p1205_p0 = pneg %p1204_p6 }
 0x1c8   : > { %p1210_p13 = pnand %p1209_p5, %p1205_p0 }
 0x1ca   : > { %1213 = shalt.err (!%p1210_p13)
}
 0x1cb   : > { %s1280_s21 = smov 128   ;;  %s1281_s20 = smov 8  }
 0x1cc   : > { %965 = dma.vmem_to_hbm [thread:$0]  (%p1805_p11), %s1733_s10, 256, %s1731_s22, %s732_s1, %s1280_s21, %s1280_s21, %s1281_s20  }
 0x1cd PF: > { %s760_s12 = sand.u32 1, %s1252_s26   ;;  %p1806_p2 = scmp.ne.s32.totalorder %s1793_s15, 0 }
 0x1ce   : > { %p1807_p8 = scmp.ge.s32.totalorder %s1264_s29, 2  ;;  %s761_s23 = scalar_lea.sflag [#allocation5], %s760_s12 }
 0x1d0   : > { %p972_p7 = pnand %p1807_p8, %p1806_p2 }
 0x1d2   : > { %p973_p9 = pneg %p972_p7 }
 0x1d4   : > { %1247 = dma.done.wait (%p973_p9), %s761_s23, 256  }
 0x1d5   : > { %1249 = vsyncadd (%p973_p9), %s761_s23, 4294967040  ;;  %s1808_s17 = sld [smem:[#allocation19_spill]]  ;;  %p28_p10 = scmp.ge.s32.totalorder %s1350_s8, 4  }
 0x1d6   : > { %s1809_s26 = smov %s1256_s27  ;;  %s1810_s27 = smov %s1260_s28 }
 0x1d7   : > { %s1812_s29 = smov %s1350_s8  ;;  %30 = sbr.rel (!%p28_p10) target bundleno = 13 (0xd), region = 135 }
 0x1db   : > { %s1811_s28 = smov %s1808_s17 }
 0x1dc   :  { %766 = vsyncpa [#allocation4], 1 }
 0x1dd   :  { %768 = vsyncpa [#allocation4 + $0x1], 1 }
 0x1de   :  { %769 = vsyncpa [#allocation9], 1 }
 0x1df   :  { %771 = vsyncpa [#allocation9 + $0x1], 1 }
 0x1e0   :  { %772 = vsyncpa [#allocation12], 1 }
 0x1e1   :  { %774 = vsyncpa [#allocation12 + $0x1], 1 }
 0x1e2   :  { %775 = vsyncpa [#allocation5], 1 }
 0x1e3   :  { %777 = vsyncpa [#allocation5 + $0x1], 1 }
 0x1e4   :  { %778 = vsyncpa [#allocation6], 1 }
 0x1e5   :  { %780 = vsyncpa [#allocation6 + $0x1], 1 }

</bundles_post_ra>
